<compile_context>
chip_gen: v5e
topology: v5e:2x2
jax: 0.10.0
libtpu: 0.0.40
codegen_flags: <defaults>
</compile_context>

<pallas_src>
import jax
import jax.numpy as jnp
from jax import lax
from jax.experimental import pallas as pl
from jax.experimental.pallas import tpu as pltpu

LANE = 128
SUBLANE = 8
EPS = 1e-5


def _round_up(x, m):
    return ((x + m - 1) // m) * m


# ---------------------------------------------------------------------------
# Kernel: one grid step == one TILE_N row-tile belonging to exactly one type.
#   gid_ref  : SMEM int32 [n_tiles]   node-type id of this row tile
#   dims_ref : SMEM int32 [2*T]       flattened (true in_dim, true hidden) / type
#   x_ref    : [TILE_N, D]  bf16      features (zero-padded lanes / rows)
#   w1_ref   : [D, H]       bf16      Linear1 weight (transposed, LN1 affine folded)
#   b1_ref   : [1, H]       f32
#   w2_ref   : [H, O]       bf16      Linear2 weight (transposed, LN2 affine folded)
#   b2_ref   : [1, O]       f32
#   o_ref    : [TILE_N, O]  f32       lane-dense output tile
# ---------------------------------------------------------------------------
def _mlp2_kernel(gid_ref, dims_ref, x_ref, w1_ref, b1_ref, w2_ref, b2_ref, o_ref):
    g = gid_ref[pl.program_id(0)]
    d_in = dims_ref[2 * g]
    d_h = dims_ref[2 * g + 1]

    D = x_ref.shape[-1]
    H = w1_ref.shape[-1]

    # ---- LayerNorm over the true in_dim lanes (affine already folded in w1/b1) ----
    x = x_ref[...].astype(jnp.float32)                       # padded lanes are 0
    inv_in = 1.0 / d_in.astype(jnp.float32)
    mu = jnp.sum(x, axis=-1, keepdims=True) * inv_in
    m_in = (lax.broadcasted_iota(jnp.int32, (1, D), 1) < d_in).astype(jnp.float32)
    diff = (x - mu) * m_in
    var = jnp.sum(diff * diff, axis=-1, keepdims=True) * inv_in
    xn = diff * lax.rsqrt(var + EPS)

    # ---- Linear1 (+folded LN1 affine) -> Tanh  (bf16 MXU, f32 accumulate) ----
    h = jnp.dot(xn.astype(jnp.bfloat16), w1_ref[...],
                preferred_element_type=jnp.float32) + b1_ref[...]
    h = jnp.tanh(h)                                          # padded lanes: tanh(0)=0

    # ---- LayerNorm over the true hidden lanes ----
    inv_h = 1.0 / d_h.astype(jnp.float32)
    mu2 = jnp.sum(h, axis=-1, keepdims=True) * inv_h
    m_h = (lax.broadcasted_iota(jnp.int32, (1, H), 1) < d_h).astype(jnp.float32)
    diff2 = (h - mu2) * m_h
    var2 = jnp.sum(diff2 * diff2, axis=-1, keepdims=True) * inv_h
    hn = diff2 * lax.rsqrt(var2 + EPS)

    # ---- Linear2 (+folded LN2 affine) -> Tanh, lane-dense full-width store ----
    y = jnp.dot(hn.astype(jnp.bfloat16), w2_ref[...],
                preferred_element_type=jnp.float32) + b2_ref[...]
    o_ref[...] = jnp.tanh(y)


# ---------------------------------------------------------------------------
# Host wrapper: grouped-row packing + LN-affine folding, then one pallas_call.
# params[t] follows PyTorch conventions:
#   ln1_w/ln1_b: [in_t], w1: [hid_t, in_t], b1: [hid_t],
#   ln2_w/ln2_b: [hid_t], w2: [out_dim, hid_t], b2: [out_dim]
# ---------------------------------------------------------------------------
def grami_initializer_forward(x_dict, params, out_dim, *, tile_n=256):
    types = list(x_dict.keys())
    in_dims = [x_dict[t].shape[1] for t in types]
    hid_dims = [(d + 1) // 2 for d in in_dims]
    rows = [x_dict[t].shape[0] for t in types]

    d_pack = _round_up(max(in_dims), SUBLANE)        # true feature width (NOT 128-padded)
    h_pad = _round_up(max(hid_dims), LANE)
    o_pad = _round_up(out_dim, LANE)
    tile_n = _round_up(max(SUBLANE,
                           min(tile_n, _round_up(max(rows), SUBLANE))), SUBLANE)

    # ---- grouped rows: concat all types, each padded to a whole number of tiles ----
    x_parts, gid_parts, rows_pad = [], [], []
    for ti, t in enumerate(types):
        x = x_dict[t].astype(jnp.float32)
        rp = _round_up(x.shape[0], tile_n)
        rows_pad.append(rp)
        x_parts.append(jnp.pad(x, ((0, rp - x.shape[0]), (0, d_pack - x.shape[1]))))
        gid_parts.append(jnp.full((rp // tile_n,), ti, jnp.int32))
    x_all = jnp.concatenate(x_parts).astype(jnp.bfloat16)     # [R, d_pack] bf16
    gid = jnp.concatenate(gid_parts)                          # [n_tiles] int32
    n_tiles = int(gid.shape[0])

    # ---- fold LN affines into the following Linear (exact, f32, once on host) ----
    def pad2(a, r, c):
        return jnp.pad(a, ((0, r - a.shape[0]), (0, c - a.shape[1])))

    w1s, b1s, w2s, b2s = [], [], [], []
    for t in types:
        p = params[t]
        w1t = p["w1"].T.astype(jnp.float32)                   # [in,  hid]
        w2t = p["w2"].T.astype(jnp.float32)                   # [hid, out]
        w1f = p["ln1_w"][:, None] * w1t
        b1f = p["b1"] + p["ln1_b"] @ w1t
        w2f = p["ln2_w"][:, None] * w2t
        b2f = p["b2"] + p["ln2_b"] @ w2t
        w1s.append(pad2(w1f, d_pack, h_pad))
        b1s.append(jnp.pad(b1f, (0, h_pad - b1f.shape[0]))[None, :])
        w2s.append(pad2(w2f, h_pad, o_pad))
        b2s.append(jnp.pad(b2f, (0, o_pad - b2f.shape[0]))[None, :])
    w1_all = jnp.stack(w1s).astype(jnp.bfloat16)              # [T, d_pack, h_pad]
    b1_all = jnp.stack(b1s)                                   # [T, 1, h_pad] f32
    w2_all = jnp.stack(w2s).astype(jnp.bfloat16)              # [T, h_pad, o_pad]
    b2_all = jnp.stack(b2s)                                   # [T, 1, o_pad] f32
    dims = jnp.stack([jnp.array(in_dims, jnp.int32),
                      jnp.array(hid_dims, jnp.int32)], axis=1).reshape(-1)  # [2T]

    def row_map(i, gid_ref, dims_ref):          # prefetch refs are positional
        return (i, 0)

    def typ_map(i, gid_ref, dims_ref):          # per-type block from prefetched gid
        return (gid_ref[i], 0, 0)

    y_all = pl.pallas_call(
        _mlp2_kernel,
        out_shape=jax.ShapeDtypeStruct((n_tiles * tile_n, o_pad), jnp.float32),
        grid_spec=pltpu.PrefetchScalarGridSpec(
            num_scalar_prefetch=2,
            grid=(n_tiles,),
            in_specs=[
                pl.BlockSpec((tile_n, d_pack), row_map),       # x rows      (bf16)
                pl.BlockSpec((None, d_pack, h_pad), typ_map),  # w1          (bf16)
                pl.BlockSpec((None, 1, h_pad), typ_map),       # b1
                pl.BlockSpec((None, h_pad, o_pad), typ_map),   # w2          (bf16)
                pl.BlockSpec((None, 1, o_pad), typ_map),       # b2
            ],
            out_specs=pl.BlockSpec((tile_n, o_pad), row_map),
        ),
        compiler_params=pltpu.CompilerParams(
            dimension_semantics=("parallel",)),                # shard row tiles on v7x TCs
    )(gid, dims, x_all, w1_all, b1_all, w2_all, b2_all)

    out, off = {}, 0
    for ti, t in enumerate(types):
        out[t] = y_all[off:off + x_dict[t].shape[0], :out_dim]
        off += rows_pad[ti]
    return out


# ---------------------------------------------------------------------------
# Pure-JAX reference (f32, unfolded affine) for a loose correctness check.
# ---------------------------------------------------------------------------
def _mlp2_ref(x, p):
    def ln(v, g, b):
        mu = jnp.mean(v, axis=-1, keepdims=True)
        var = jnp.mean((v - mu) ** 2, axis=-1, keepdims=True)
        return (v - mu) / jnp.sqrt(var + EPS) * g + b

    h = jnp.tanh(ln(x, p["ln1_w"], p["ln1_b"]) @ p["w1"].T + p["b1"])
    return jnp.tanh(ln(h, p["ln2_w"], p["ln2_b"]) @ p["w2"].T + p["b2"])


# ---------------------------------------------------------------------------
# Deterministic small demo
# ---------------------------------------------------------------------------
if __name__ == "__main__":
    key = jax.random.PRNGKey(0)
    keys = iter(jax.random.split(key, 64))

    out_dim = 32
    embed_size = 16
    # (num_nodes, in_dim) per node type; 'number' features are the (synthetic)
    # digit embeddings of width embed_size, built outside the kernel.
    node_cfg = {"paper": (8, 10), "author": (12, 14), "number": (6, embed_size)}

    x_dict = {t: jax.random.normal(next(keys), (n, d), jnp.float32)
              for t, (n, d) in node_cfg.items()}

    def glorot(k, shape):
        lim = (6.0 / (shape[0] + shape[-1])) ** 0.5
        return jax.random.uniform(k, shape, jnp.float32, -lim, lim)

    params = {}
    for t, (_, d_in) in node_cfg.items():
        h_t = (d_in + 1) // 2
        params[t] = {
            # non-trivial LN affines so the host-side fold is exercised
            "ln1_w": 1.0 + 0.1 * jax.random.normal(next(keys), (d_in,), jnp.float32),
            "ln1_b": 0.1 * jax.random.normal(next(keys), (d_in,), jnp.float32),
            "w1": glorot(next(keys), (h_t, d_in)),
            "b1": jax.random.uniform(next(keys), (h_t,), jnp.float32, -0.1, 0.1),
            "ln2_w": 1.0 + 0.1 * jax.random.normal(next(keys), (h_t,), jnp.float32),
            "ln2_b": 0.1 * jax.random.normal(next(keys), (h_t,), jnp.float32),
            "w2": glorot(next(keys), (out_dim, h_t)),
            "b2": jax.random.uniform(next(keys), (out_dim,), jnp.float32, -0.1, 0.1),
        }

    out = grami_initializer_forward(x_dict, params, out_dim)
    jax.block_until_ready(out)

    ok = True
    for t, y in out.items():
        assert y.shape == (node_cfg[t][0], out_dim)
        ok = ok and bool(jnp.all(jnp.isfinite(y)))
        ref = _mlp2_ref(x_dict[t], params[t])
        err = float(jnp.max(jnp.abs(y - ref)))
        ok = ok and (err < 0.1)   # bf16 MXU / bf16 activation-I/O tolerance
    assert ok, "GraMIInitializer Pallas output mismatch / non-finite"

    print("KERNEL_OK")
</pallas_src>

<mosaic_0001>
module attributes {stable_mosaic.version = 11 : i64} {
  func.func @_mlp2_kernel(%arg0: i32, %arg1: memref<3xi32, #tpu.memory_space<smem>>, %arg2: memref<6xi32, #tpu.memory_space<smem>>, %arg3: memref<16x16xbf16, #tpu.memory_space<vmem>>, %arg4: memref<1x16x128xbf16, #tpu.memory_space<vmem>>, %arg5: memref<1x1x128xf32, #tpu.memory_space<vmem>>, %arg6: memref<1x128x128xbf16, #tpu.memory_space<vmem>>, %arg7: memref<1x1x128xf32, #tpu.memory_space<vmem>>, %arg8: memref<16x128xf32, #tpu.memory_space<vmem>>) attributes {dimension_semantics = [#tpu.dimension_semantics<parallel>], iteration_bounds = array<i64: 3>, scalar_prefetch = 2 : i64, scratch_operands = 0 : i64, tpu.core_type = #tpu.core_type<tc>, window_params = [{transform_indices = @transform_0, window_bounds = array<i64: 16, 16>}, {transform_indices = @transform_1, window_bounds = array<i64: 1, 16, 128>}, {transform_indices = @transform_2, window_bounds = array<i64: 1, 1, 128>}, {transform_indices = @transform_3, window_bounds = array<i64: 1, 128, 128>}, {transform_indices = @transform_4, window_bounds = array<i64: 1, 1, 128>}, {transform_indices = @transform_5, window_bounds = array<i64: 16, 128>}]} {
    %0 = arith.index_cast %arg0 : i32 to index
    %1 = memref.load %arg1[%0] : memref<3xi32, #tpu.memory_space<smem>>
    %c2_i32 = arith.constant 2 : i32
    %2 = arith.muli %c2_i32, %1 : i32
    %3 = arith.index_cast %2 : i32 to index
    %4 = memref.load %arg2[%3] : memref<6xi32, #tpu.memory_space<smem>>
    %c2_i32_0 = arith.constant 2 : i32
    %5 = arith.muli %c2_i32_0, %1 : i32
    %c1_i32 = arith.constant 1 : i32
    %6 = arith.addi %5, %c1_i32 : i32
    %7 = arith.index_cast %6 : i32 to index
    %8 = memref.load %arg2[%7] : memref<6xi32, #tpu.memory_space<smem>>
    %c0 = arith.constant 0 : index
    %c0_1 = arith.constant 0 : index
    %9 = vector.load %arg3[%c0, %c0_1] : memref<16x16xbf16, #tpu.memory_space<vmem>>, vector<16x16xbf16>
    %10 = arith.extf %9 : vector<16x16xbf16> to vector<16x16xf32>
    %11 = arith.sitofp %4 : i32 to f32
    %cst = arith.constant 1.000000e+00 : f32
    %12 = arith.divf %cst, %11 : f32
    %cst_2 = arith.constant dense<0.000000e+00> : vector<16xf32>
    %13 = vector.multi_reduction <add>, %10, %cst_2 [1] : vector<16x16xf32> to vector<16xf32>
    %14 = vector.shape_cast %13 : vector<16xf32> to vector<16x1xf32>
    %15 = vector.broadcast %12 : f32 to vector<16x1xf32>
    %16 = arith.mulf %14, %15 : vector<16x1xf32>
    %17 = tpu.iota {dimensions = array<i32: 1>} : vector<1x16xi32>
    %18 = vector.broadcast %4 : i32 to vector<1x16xi32>
    %19 = arith.cmpi slt, %17, %18 : vector<1x16xi32>
    %20 = arith.extui %19 : vector<1x16xi1> to vector<1x16xi32>
    %21 = arith.sitofp %20 : vector<1x16xi32> to vector<1x16xf32>
    %22 = vector.broadcast %16 : vector<16x1xf32> to vector<16x16xf32>
    %23 = arith.subf %10, %22 : vector<16x16xf32>
    %24 = vector.broadcast %21 : vector<1x16xf32> to vector<16x16xf32>
    %25 = arith.mulf %23, %24 : vector<16x16xf32>
    %26 = arith.mulf %25, %25 : vector<16x16xf32>
    %cst_3 = arith.constant dense<0.000000e+00> : vector<16xf32>
    %27 = vector.multi_reduction <add>, %26, %cst_3 [1] : vector<16x16xf32> to vector<16xf32>
    %28 = vector.shape_cast %27 : vector<16xf32> to vector<16x1xf32>
    %29 = vector.broadcast %12 : f32 to vector<16x1xf32>
    %30 = arith.mulf %28, %29 : vector<16x1xf32>
    %cst_4 = arith.constant 9.99999974E-6 : f32
    %31 = vector.broadcast %cst_4 : f32 to vector<16x1xf32>
    %32 = arith.addf %30, %31 : vector<16x1xf32>
    %33 = math.rsqrt %32 : vector<16x1xf32>
    %34 = vector.broadcast %33 : vector<16x1xf32> to vector<16x16xf32>
    %35 = arith.mulf %25, %34 : vector<16x16xf32>
    %36 = arith.truncf %35 : vector<16x16xf32> to vector<16x16xbf16>
    %c0_5 = arith.constant 0 : index
    %c0_6 = arith.constant 0 : index
    %c0_7 = arith.constant 0 : index
    %37 = vector.load %arg4[%c0_5, %c0_6, %c0_7] : memref<1x16x128xbf16, #tpu.memory_space<vmem>>, vector<1x16x128xbf16>
    %38 = vector.shape_cast %37 : vector<1x16x128xbf16> to vector<16x128xbf16>
    %cst_8 = arith.constant dense<0.000000e+00> : vector<16x128xf32>
    %39 = tpu.matmul %36, %38, %cst_8 {dimension_numbers = #tpu.dot_dimension_numbers<[1], [0], [0], [1], [0, 0, 1, 1], [], []>} : vector<16x16xbf16>, vector<16x128xbf16>, vector<16x128xf32> -> vector<16x128xf32>
    %c0_9 = arith.constant 0 : index
    %c0_10 = arith.constant 0 : index
    %c0_11 = arith.constant 0 : index
    %40 = vector.load %arg5[%c0_9, %c0_10, %c0_11] : memref<1x1x128xf32, #tpu.memory_space<vmem>>, vector<1x1x128xf32>
    %41 = vector.shape_cast %40 : vector<1x1x128xf32> to vector<1x128xf32>
    %42 = vector.broadcast %41 : vector<1x128xf32> to vector<16x128xf32>
    %43 = arith.addf %39, %42 : vector<16x128xf32>
    %44 = math.tanh %43 : vector<16x128xf32>
    %45 = arith.sitofp %8 : i32 to f32
    %cst_12 = arith.constant 1.000000e+00 : f32
    %46 = arith.divf %cst_12, %45 : f32
    %cst_13 = arith.constant dense<0.000000e+00> : vector<16xf32>
    %47 = vector.multi_reduction <add>, %44, %cst_13 [1] : vector<16x128xf32> to vector<16xf32>
    %48 = vector.shape_cast %47 : vector<16xf32> to vector<16x1xf32>
    %49 = vector.broadcast %46 : f32 to vector<16x1xf32>
    %50 = arith.mulf %48, %49 : vector<16x1xf32>
    %51 = tpu.iota {dimensions = array<i32: 1>} : vector<1x128xi32>
    %52 = vector.broadcast %8 : i32 to vector<1x128xi32>
    %53 = arith.cmpi slt, %51, %52 : vector<1x128xi32>
    %54 = arith.extui %53 : vector<1x128xi1> to vector<1x128xi32>
    %55 = arith.sitofp %54 : vector<1x128xi32> to vector<1x128xf32>
    %56 = vector.broadcast %50 : vector<16x1xf32> to vector<16x128xf32>
    %57 = arith.subf %44, %56 : vector<16x128xf32>
    %58 = vector.broadcast %55 : vector<1x128xf32> to vector<16x128xf32>
    %59 = arith.mulf %57, %58 : vector<16x128xf32>
    %60 = arith.mulf %59, %59 : vector<16x128xf32>
    %cst_14 = arith.constant dense<0.000000e+00> : vector<16xf32>
    %61 = vector.multi_reduction <add>, %60, %cst_14 [1] : vector<16x128xf32> to vector<16xf32>
    %62 = vector.shape_cast %61 : vector<16xf32> to vector<16x1xf32>
    %63 = vector.broadcast %46 : f32 to vector<16x1xf32>
    %64 = arith.mulf %62, %63 : vector<16x1xf32>
    %cst_15 = arith.constant 9.99999974E-6 : f32
    %65 = vector.broadcast %cst_15 : f32 to vector<16x1xf32>
    %66 = arith.addf %64, %65 : vector<16x1xf32>
    %67 = math.rsqrt %66 : vector<16x1xf32>
    %68 = vector.broadcast %67 : vector<16x1xf32> to vector<16x128xf32>
    %69 = arith.mulf %59, %68 : vector<16x128xf32>
    %70 = arith.truncf %69 : vector<16x128xf32> to vector<16x128xbf16>
    %c0_16 = arith.constant 0 : index
    %c0_17 = arith.constant 0 : index
    %c0_18 = arith.constant 0 : index
    %71 = vector.load %arg6[%c0_16, %c0_17, %c0_18] : memref<1x128x128xbf16, #tpu.memory_space<vmem>>, vector<1x128x128xbf16>
    %72 = vector.shape_cast %71 : vector<1x128x128xbf16> to vector<128x128xbf16>
    %cst_19 = arith.constant dense<0.000000e+00> : vector<16x128xf32>
    %73 = tpu.matmul %70, %72, %cst_19 {dimension_numbers = #tpu.dot_dimension_numbers<[1], [0], [0], [1], [0, 0, 1, 1], [], []>} : vector<16x128xbf16>, vector<128x128xbf16>, vector<16x128xf32> -> vector<16x128xf32>
    %c0_20 = arith.constant 0 : index
    %c0_21 = arith.constant 0 : index
    %c0_22 = arith.constant 0 : index
    %74 = vector.load %arg7[%c0_20, %c0_21, %c0_22] : memref<1x1x128xf32, #tpu.memory_space<vmem>>, vector<1x1x128xf32>
    %75 = vector.shape_cast %74 : vector<1x1x128xf32> to vector<1x128xf32>
    %76 = vector.broadcast %75 : vector<1x128xf32> to vector<16x128xf32>
    %77 = arith.addf %73, %76 : vector<16x128xf32>
    %78 = math.tanh %77 : vector<16x128xf32>
    %c0_23 = arith.constant 0 : index
    %c0_24 = arith.constant 0 : index
    %79 = vector.load %arg8[%c0_23, %c0_24] : memref<16x128xf32, #tpu.memory_space<vmem>>, vector<16x128xf32>
    tpu.vector_store %arg8[%c0_23, %c0_24], %78 {strides = array<i32>} : memref<16x128xf32, #tpu.memory_space<vmem>>, vector<16x128xf32>,
    return
  }
  func.func @transform_0(%arg0: i32, %arg1: memref<3xi32, #tpu.memory_space<smem>>, %arg2: memref<6xi32, #tpu.memory_space<smem>>) -> (i32, i32) {
    %c0_i32 = arith.constant 0 : i32
    %c0_i32_0 = arith.constant 0 : i32
    return %arg0, %c0_i32 : i32, i32
  }
  func.func @transform_1(%arg0: i32, %arg1: memref<3xi32, #tpu.memory_space<smem>>, %arg2: memref<6xi32, #tpu.memory_space<smem>>) -> (i32, i32, i32) {
    %0 = arith.index_cast %arg0 : i32 to index
    %1 = memref.load %arg1[%0] : memref<3xi32, #tpu.memory_space<smem>>
    %c0_i32 = arith.constant 0 : i32
    %c0_i32_0 = arith.constant 0 : i32
    %c0_i32_1 = arith.constant 0 : i32
    return %1, %c0_i32, %c0_i32_0 : i32, i32, i32
  }
  func.func @transform_2(%arg0: i32, %arg1: memref<3xi32, #tpu.memory_space<smem>>, %arg2: memref<6xi32, #tpu.memory_space<smem>>) -> (i32, i32, i32) {
    %0 = arith.index_cast %arg0 : i32 to index
    %1 = memref.load %arg1[%0] : memref<3xi32, #tpu.memory_space<smem>>
    %c0_i32 = arith.constant 0 : i32
    %c0_i32_0 = arith.constant 0 : i32
    %c0_i32_1 = arith.constant 0 : i32
    return %1, %c0_i32, %c0_i32_0 : i32, i32, i32
  }
  func.func @transform_3(%arg0: i32, %arg1: memref<3xi32, #tpu.memory_space<smem>>, %arg2: memref<6xi32, #tpu.memory_space<smem>>) -> (i32, i32, i32) {
    %0 = arith.index_cast %arg0 : i32 to index
    %1 = memref.load %arg1[%0] : memref<3xi32, #tpu.memory_space<smem>>
    %c0_i32 = arith.constant 0 : i32
    %c0_i32_0 = arith.constant 0 : i32
    %c0_i32_1 = arith.constant 0 : i32
    return %1, %c0_i32, %c0_i32_0 : i32, i32, i32
  }
  func.func @transform_4(%arg0: i32, %arg1: memref<3xi32, #tpu.memory_space<smem>>, %arg2: memref<6xi32, #tpu.memory_space<smem>>) -> (i32, i32, i32) {
    %0 = arith.index_cast %arg0 : i32 to index
    %1 = memref.load %arg1[%0] : memref<3xi32, #tpu.memory_space<smem>>
    %c0_i32 = arith.constant 0 : i32
    %c0_i32_0 = arith.constant 0 : i32
    %c0_i32_1 = arith.constant 0 : i32
    return %1, %c0_i32, %c0_i32_0 : i32, i32, i32
  }
  func.func @transform_5(%arg0: i32, %arg1: memref<3xi32, #tpu.memory_space<smem>>, %arg2: memref<6xi32, #tpu.memory_space<smem>>) -> (i32, i32) {
    %c0_i32 = arith.constant 0 : i32
    %c0_i32_0 = arith.constant 0 : i32
    return %arg0, %c0_i32 : i32, i32
  }
}

</mosaic_0001>

<bundles_post_ra>
// kernel: tpu_custom_call.1
= control target key start
LH: loop header
LB: loop body
LE: loop exit
PB: predicated region body
PF: predicated region fallthrough
CT: control target
= control target key end

     0   :  { %s1080_s30 = smov [#allocation3]   ;;  %s1081_s8 = smov [#allocation4]   ;;  %s1359_s0 = inlined_call_operand.vmem [shape: s32[3], index: 0, kind: input, shape index: {}]   ;;  %s1360_s2 = inlined_call_operand.vmem [shape: bf16[48,16], index: 2, kind: input, shape index: {}]   ;;  %s1361_s3 = inlined_call_operand.vmem [shape: bf16[3,16,128], index: 3, kind: input, shape index: {}]   ;;  %s1362_s4 = inlined_call_operand.vmem [shape: f32[3,1,128], index: 4, kind: input, shape index: {}]   ;;  %s1363_s5 = inlined_call_operand.hbm [shape: bf16[3,128,128], index: 5, kind: input, shape index: {}]   ;;  %s1364_s6 = inlined_call_operand.vmem [shape: f32[3,1,128], index: 6, kind: input, shape index: {}]   ;;  %s1365_s7 = inlined_call_operand.hbm [shape: f32[48,128], index: 7, kind: output, shape index: {}]   ;;  %s1366_s1 = inlined_call_operand.vmem [shape: s32[6], index: 1, kind: input, shape index: {}]  }
   0x1   :  { %s13_s26 = sshll.u32 %s1359_s0, 4  ;;  %s18_s29 = sshll.u32 %s1366_s1, 4  ;;  %s14_s26 = int_to_ptr.vmem [resolvable:$true] %s13_s26  ;;  %s19_s29 = int_to_ptr.vmem [resolvable:$true] %s18_s29 }
   0x2   :  { %16 = dma.vmem_to_smem %s14_s26, 16, %s1080_s30, [#allocation2] }
   0x3   :  { %21 = dma.vmem_to_smem %s19_s29, 16, %s1081_s8, [#allocation2] }
   0x4   :  { %1042 = dma.done.wait [#allocation2], 32 }
   0x5   :  { %1043 = vsyncadd [#allocation2], 4294967264 }
   0x6   :  { %24 = sfence }
   0x7   :  { %25 = vsyncpa [#allocation6], 0 }
   0x8   :  { %27 = vsyncpa [#allocation6 + $0x1], 0 }
   0x9   :  { %28 = vsyncpa [#allocation7], 0 }
   0xa   :  { %30 = vsyncpa [#allocation7 + $0x1], 0  ;;  %s1133_s9 = smov 0   ;;  %s1135_s0 = smov 0  }
   0xb   :  { %s1137_s10 = smov 0   ;;  %s1139_s1 = smov 0  }
   0xc   :  { %s1141_s11 = smov 0   ;;  %s1143_s12 = smov 0  }
   0xd   :  { %s1145_s13 = smov 0  }
   0xe LB: > { %1371 = sst [smem:[#allocation14_spill]] %s1062_s10  ;;  %s1167_s14 = sadd.s32 4294967295, %s1078_s13   ;;  %s1078_s13 = sphi %s1145_s13, %s1382_s13   ;;  %s1074_s12 = sphi %s1143_s12, %s1386_s12   ;;  %s1070_s11 = sphi %s1141_s11, %s1390_s11   ;;  %s1066_s1 = sphi %s1139_s1, %s1389_s1   ;;  %s1062_s10 = sphi %s1137_s10, %s1384_s10   ;;  %s1058_s0 = sphi %s1135_s0, %s1388_s0   ;;  %s1054_s9 = sphi %s1133_s9, %s1387_s9  }
   0xf   : > { %1372 = sst [smem:[#allocation15_spill]] %s1074_s12  ;;  %s751_s15 = sadd.s32 4294967294, %s1078_s13  }
  0x10   : > { %s1171_s16 = sadd.s32 1, %s1078_s13   ;;  %s122_s17 = sld [smem:[#allocation3 + %s1078_s13]] }
  0x11   : > { %1373 = sst [smem:[#allocation16_spill]] %s1171_s16  ;;  %s127_s19 = sadd.s32 1, %s1074_s12 }
  0x12   : > { %s123_s18 = sld [smem:[#allocation3 + %s1171_s16]]  ;;  %p134_p0 = scmp.ne.s32.totalorder %s1074_s12, %s1070_s11 }
  0x13   : > { %p135_p1 = scmp.eq.s32.totalorder %s1078_s13, 0  ;;  %p140_p2 = scmp.ne.s32.totalorder %s1070_s11, %s1066_s1 }
  0x14   : > { %p141_p3 = scmp.eq.s32.totalorder %s1167_s14, 0  ;;  %s178_s21 = ssub.s32 %s1078_s13, %s1171_s16 }
  0x15   : > { %p1181_p4 = por %p135_p1, %p134_p0  ;;  %p179_p6 = scmp.eq.s32.totalorder %s178_s21, 0 }
  0x16   : > { %p1187_p5 = por %p141_p3, %p140_p2  ;;  %s181_s23 = sadd.s32 1, %s1062_s10 }
  0x17   : > { %p191_p7 = scmp.ne.s32.totalorder %s1062_s10, %s1058_s0  ;;  %p192_p8 = scmp.eq.s32.totalorder %s1167_s14, 2 }
  0x18   : > { %s124_s24 = ssub.s32 %s122_s17, %s123_s18  ;;  %p197_p10 = scmp.ne.s32.totalorder %s1058_s0, %s1054_s9 }
  0x19   : > { %p125_p9 = scmp.eq.s32.totalorder %s124_s24, 0  ;;  %p1203_p11 = por %p192_p8, %p191_p7 }
  0x1a   : > { %s1198_s25 = scalar_select %p179_p6, %s1062_s10, %s181_s23  }
  0x1b   : > { %s1201_s26 = scalar_select %p125_p9, %s1074_s12, %s127_s19  }
  0x1c   : > { %1376 = sst [smem:[#allocation17_spill]] %s1198_s25  ;;  %p198_p12 = scmp.eq.s32.totalorder %s751_s15, 2 }
  0x1d   : > { %1377 = sst [smem:[#allocation18_spill]] %s1201_s26  ;;  %p845_p13 = scmp.lt.s32.totalorder %s1078_s13, 3 }
  0x1e   : > { %p1208_p0 = por %p198_p12, %p197_p10  ;;  %s245_s29 = sand.u32 1, %s1074_s12  }
  0x1f   : > { %s754_s30 = sshll.u32 %s245_s29, 6  ;;  %p1215_p1 = pnand %p845_p13, %p1181_p4 }
  0x20   : > { %s829_s1 = scalar_select %p1181_p4, [#allocation3], [#allocation9] }
  0x21   : > { %s830_s17 = scalar_select %p1181_p4, %s1078_s13, 0 }
  0x22   : > { %s1392_s1 = smov (!%p845_p13, %s829_s1), [#allocation10]  ;;  %s249_s15 = scalar_lea.vmem [#allocation5], %s754_s30 }
  0x23   : > { %s1394_s17 = smov (!%p845_p13, %s830_s17), 0  ;;  %s1224_s19 = sshll.u32 %s249_s15, 4  ;;  %s259_s19 = int_to_ptr.vmem [resolvable:$true] %s1224_s19 }
  0x24   : > { %s250_s18 = sld [smem:[%s1392_s1 + %s1394_s17]]  ;;  %p757_p2 = scmp.ge.s32.totalorder %s1078_s13, 1 }
  0x25   : > { %p274_p3 = scmp.lt.s32.totalorder %s1078_s13, 4  ;;  %s246_s1 = scalar_lea.sflag [#allocation6], %s245_s29 }
  0x26   : > { %p960_p7 = pneg %p1215_p1  ;;  %s963_s10 = scalar_lea.hbm %s1363_s5, 192 }
  0x27   : > { %p1228_p6 = pnand %p757_p2, %p274_p3 }
  0x2a   : > { %s809_s23 = sshll.u32 %s250_s18, 6 }
  0x2b   : > { %s255_s20 = scalar_lea.hbm %s1363_s5, %s809_s23 }
  0x2c   : > { %s256_s12 = sshll.u32 %s255_s20, 4  ;;  %s257_s12 = int_to_ptr.hbm [resolvable:$true] %s256_s12 }
  0x2d   : > { %s956_s17 = sshra.s32 %s257_s12, 4  ;;  %s957_s17 = int_to_ptr.hbm [resolvable:$true] %s956_s17 }
  0x2e   : > { %s958_s30 = scalar_lea.hbm %s957_s17, 64  ;;  %p964_p10 = scmp.lt.s32.totalorder %s957_s17, %s1363_s5 }
  0x2f   : > { %p959_p4 = scmp.ne.s32.totalorder %s957_s17, %s958_s30  ;;  %p965_p12 = scmp.lt.s32.totalorder %s963_s10, %s958_s30 }
  0x31   : > { %p961_p8 = pnand %p960_p7, %p959_p4  ;;  %p966_p13 = por %p965_p12, %p964_p10 }
  0x33   : > { %p962_p9 = pneg %p961_p8 }
  0x35   : > { %p967_p2 = pnand %p966_p13, %p962_p9 }
  0x37   : > { %970 = shalt.err (!%p967_p2)
}
  0x38   : > { %s1082_s26 = smov 64   ;;  %s1083_s29 = smov 4  }
  0x39   : > { %840 = dma.hbm_to_vmem [thread:$0]  (!%p1215_p1), %s257_s12, 1024, %s259_s19, %s246_s1, %s1082_s26, %s1082_s26, %s1083_s29  }
  0x3a   : > { %278 = sbr.rel (%p1228_p6) target bundleno = 905 (0x389), region = 40  ;;  %s280_s25 = sand.u32 (!%p1228_p6), 1, %s1070_s11  }
  0x3b   : > { %s758_s23 = sshll.u32 (!%p1228_p6), %s280_s25, 6  ;;  %s281_s24 = scalar_lea.sflag (!%p1228_p6), [#allocation6], %s280_s25 }
  0x3c   : > { %s1249_s20 = scalar_lea.vmem (!%p1228_p6), [#allocation5], %s758_s23 }
  0x3f   : > { %1045 = dma.done.wait (%p1187_p5), %s281_s24, 1024  }
  0x40   : > { %1047 = vsyncadd (%p1187_p5), %s281_s24, 4294966272  ;;  %s760_s10 = sshll.u32 %s1167_s14, 1  ;;  %s1257_s12 = sld [smem:[#allocation3 + %s1167_s14]]  ;;  %vm383_vm0 = vcmask 130048   ;;  %v393_v16 = vlaneseq  ;;  %v1084_v22 = vmov 0.0  }
  0x41   : > { %p332_p3 = scmp.lt.s32.totalorder %s760_s10, 5  ;;  %s344_s15 = sld [smem:[#allocation3 + %s1167_s14]] }
  0x42   : > { %v1267_v17 = vand.u32 127, %v393_v16  ;;  %s337_s25 = sld [smem:[#allocation3 + %s1167_s14]] }
  0x43   : > { %s1396_s10 = smov (!%p332_p3, %s760_s10), 5 }
  0x44   : > { %s761_s16 = sshll.u32 %s1396_s10, 2 }
  0x45   : > { %s335_s21 = scalar_lea.vmem %s1360_s2, %s761_s16 }
  0x46   : > { %v822_v0 = vld [vmem:[%s335_s21] sm:$0xff]   ;;  %s764_s1 = sshll.u32 %s1257_s12, 1 }
  0x47   : > { %v823_v1 = vunpack.c.l.bf16 %v822_v0  ;;  %s359_s22 = sld [smem:[#allocation4 + %s764_s1]]  ;;  %v824_v3 = vunpack.c.h.bf16 %v822_v0  ;;  %p345_p5 = scmp.lt.s32.totalorder %s344_s15, 2 }
  0x48   : > { %p338_p1 = scmp.lt.s32.totalorder %s337_s25, 2  ;;  %s360_s8 = sadd.s32 1, %s764_s1 }
  0x49   : > { %v384_v2 = vsel %vm383_vm0, %v823_v1, 0.0  ;;  %v387_v4 = vsel %vm383_vm0, %v824_v3, 0.0  ;;  %s1398_s15 = smov (!%p345_p5, %s344_s15), 2  ;;  %s1287_s19 = sld [smem:[#allocation4 + %s360_s8]] }
  0x4a   : > { %385 = vadd.xlane.f32.xlu0 %v384_v2  ;;  %s347_s29 = scalar_lea.vmem %s1362_s4, %s1398_s15  ;;  %s1400_s25 = smov (!%p338_p1, %s337_s25), 2 }
  0x4b   : > { %s810_s23 = sshll.u32 %s1400_s25, 3  ;;  %v910_v0 = vld [vmem:[%s347_s29] ss:$0 sm:$0xff]  ;;  %s350_s1 = sld [smem:[#allocation3 + %s1167_s14]] }
  0x4c   : > { %s342_s16 = scalar_lea.vmem %s1361_s3, %s810_s23  ;;  %s328_s29 = sand.u32 1, %s1058_s0  }
  0x4d   : > { %s366_s17 = scvt.s32.f32 %s359_s22  ;;  %v395_v18 = vstv %s359_s22  ;;  %v811_v34 = vld [vmem:[%s342_s16] sm:$0xff]  ;;  %s759_s25 = sshll.u32 %s328_s29, 4 }
  0x4e   : > { %vm396_vm5 = vcmp.lt.s32.totalorder %v1267_v17, %v395_v18  ;;  %460 = vmatpush.bf16.msra.mxu0 %v811_v34  ;;  %s820_s23 = sshll.u32 %s1167_s14, 4  ;;  %s330_s8 = scalar_lea.vmem [#allocation8], %s759_s25 }
  0x4f   : > { %v367_v5 = vstv %s366_s17  ;;  %v765_v23 = vsel %vm396_vm5, 1.0, %v1084_v22  ;;  %s469_s21 = scvt.s32.f32 %s1287_s19  ;;  %s632_s16 = scalar_lea.hbm %s1365_s7, %s820_s23 }
  0x50   : > { %912 = vrcp.f32 %v367_v5  ;;  %v379_v8 = vand.u32 2147483648, %v367_v5  ;;  %vm373_vm1 = vweird.f32 %v367_v5  ;;  %v377_v10 = vand.u32 2147483647, %v367_v5  ;;  %s621_s22 = scalar_lea.sflag [#allocation7], %s328_s29 }
  0x51   : > { %v470_v58 = vstv %s469_s21  ;;  %p351_p6 = scmp.lt.s32.totalorder %s350_s1, 2  ;;  %s635_s21 = sshll.u32 %s632_s16, 4  ;;  %s636_s21 = int_to_ptr.hbm [resolvable:$true] %s635_s21 }
  0x52   : > { %388 = vadd.xlane.f32.xlu0 %v387_v4  ;;  %v380_v12 = vor.u32 1.1754944e-38, %v379_v8  ;;  %vm378_vm4 = vcmp.eq.f32.partialorder %v377_v10, 8.507059e+37  ;;  %v482_v61 = vand.u32 2147483648, %v470_v58  ;;  %vm476_vm12 = vweird.f32 %v470_v58  ;;  %s1000_s17 = sshra.s32 %s636_s21, 4  ;;  %s1001_s17 = int_to_ptr.hbm [resolvable:$true] %s1000_s17 }
  0x53   : > { %v480_v63 = vand.u32 2147483647, %v470_v58  ;;  %s1402_s1 = smov (!%p351_p6, %s350_s1), 2  ;;  %s1002_s14 = scalar_lea.hbm %s1001_s17, 16 }
  0x54   : > { %v483_v2 = vor.u32 1.1754944e-38, %v482_v61  ;;  %s353_s18 = scalar_lea.vmem %s1364_s6, %s1402_s1  ;;  %p1003_p4 = scmp.ne.s32.totalorder %s1001_s17, %s1002_s14 }
  0x55   : > { %vm481_vm15 = vcmp.eq.f32.partialorder %v480_v63, 8.507059e+37  ;;  %p1007_p9 = scmp.lt.s32.totalorder %s1001_s17, %s1365_s7 }
  0x56   : > { %v913_v6 = vpop.eup %912  ;;  %p1004_p7 = pnand %p1003_p4, %p1203_p11 }
  0x57   : > { %v369_v7 = vmul.f32 %v913_v6, %v367_v5  ;;  %vm374_vm2 = vweird.f32 %v913_v6 }
  0x58   : > { %vm375_vm3 = vmor %vm373_vm1, %vm374_vm2  ;;  %p1005_p8 = pneg %p1004_p7 }
  0x59   : > { %v370_v9 = vsub.f32 1.0, %v369_v7 }
  0x5b   : > { %v371_v11 = vmul.f32 %v913_v6, %v370_v9 }
  0x5d   : > { %v372_v13 = vadd.f32 %v913_v6, %v371_v11 }
  0x5f   : > { %v376_v14 = vsel %vm375_vm3, %v913_v6, %v372_v13 }
  0x60   : > { %v381_v15 = vsel %vm378_vm4, %v380_v12, %v376_v14  ;;  %v493_v12 = vstv %s1287_s19  ;;  %s633_s19 = sshll.u32 %s330_s8, 4  ;;  %s634_s19 = int_to_ptr.vmem [resolvable:$true] %s633_s19 }
  0x61   : > { %825 = vpush %v381_v15 }
  0x92   : > { %s826_s30 = spop %825 }
  0x93   : > { %v390_v19 = vstv %s826_s30  ;;  %s1006_s30 = scalar_lea.hbm %s1365_s7, 48 }
  0x94   : > { %p1008_p10 = scmp.lt.s32.totalorder %s1006_s30, %s1002_s14 }
  0x96   : > { %p1009_p12 = por %p1008_p10, %p1007_p9 }
  0x98   : > { %p1010_p13 = pnand %p1009_p12, %p1005_p8 }
  0xbd   : > { %v386_v20 = vpop.xlane.xlu0 %385 }
  0xbe   : > { %v391_v21 = vmul.f32 %v390_v19, %v386_v20 }
  0xc0   : > { %v399_v24 = vsub.f32 %v823_v1, %v391_v21 }
  0xc2   : > { %v401_v25 = vmul.f32 %v765_v23, %v399_v24 }
  0xc4   : > { %v403_v26 = vmul.f32 %v401_v25, %v401_v25 }
  0xc5   : > { %v389_v27 = vpop.xlane.xlu0 %388 }
  0xc6   : > { %v392_v28 = vmul.f32 %v390_v19, %v389_v27  ;;  %v405_v29 = vsel %vm383_vm0, %v403_v26, 0.0  ;;  %v817_v27 = vld [vmem:[%s1249_s20 + $0x28] sm:$0xff] }
  0xc7   : > { %406 = vadd.xlane.f32.xlu1 %v405_v29  ;;  %v815_v29 = vld [vmem:[%s1249_s20 + $0x18] sm:$0xff] }
  0xc8   : > { %v400_v30 = vsub.f32 %v824_v3, %v392_v28  ;;  %v816_v28 = vld [vmem:[%s1249_s20 + $0x20] sm:$0xff] }
  0xca   : > { %v402_v31 = vmul.f32 %v765_v23, %v400_v30  ;;  %v814_v30 = vld [vmem:[%s1249_s20 + $0x10] sm:$0xff] }
  0xcc   : > { %v404_v32 = vmul.f32 %v402_v31, %v402_v31 }
  0xce   : > { %v408_v33 = vsel %vm383_vm0, %v404_v32, 0.0  ;;  %v812_v32 = vld [vmem:[%s1249_s20] sm:$0xff] }
  0xcf   : > { %409 = vadd.xlane.f32.xlu1 %v408_v33 }
 0x13a   : > { %v407_v35 = vpop.xlane.xlu1 %406 }
 0x13b   : > { %v411_v36 = vmul.f32 %v407_v35, %v390_v19 }
 0x13d   : > { %v413_v37 = vadd.f32 1e-05, %v411_v36 }
 0x13f   : > { %914 = vrsqrt.f32 %v413_v37  ;;  %vm421_vm7 = vweird.f32 %v413_v37 }
 0x142   : > { %v410_v38 = vpop.xlane.xlu1 %409 }
 0x143   : > { %v412_v39 = vmul.f32 %v410_v38, %v390_v19 }
 0x145   : > { %v915_v40 = vpop.eup %914  ;;  %v414_v41 = vadd.f32 1e-05, %v412_v39 }
 0x146   : > { %v416_v42 = vmul.f32 %v915_v40, %v413_v37  ;;  %vm422_vm6 = vweird.f32 %v915_v40 }
 0x147   : > { %916 = vrsqrt.f32 %v414_v41  ;;  %vm423_vm9 = vmor %vm421_vm7, %vm422_vm6  ;;  %vm431_vm10 = vweird.f32 %v414_v41 }
 0x148   : > { %v417_v43 = vmul.f32 %v915_v40, %v416_v42  ;;  %918 = vrcp.f32 %v470_v58 }
 0x14a   : > { %v418_v44 = vmul.f32 0.5, %v417_v43 }
 0x14c   : > { %v419_v46 = vsub.f32 1.5, %v418_v44 }
 0x14d   : > { %v917_v45 = vpop.eup %916 }
 0x14e   : > { %v426_v47 = vmul.f32 %v917_v45, %v414_v41  ;;  %v420_v49 = vmul.f32 %v915_v40, %v419_v46  ;;  %vm432_vm8 = vweird.f32 %v917_v45  ;;  %v919_v59 = vpop.eup %918 }
 0x14f   : > { %vm433_vm11 = vmor %vm431_vm10, %vm432_vm8  ;;  %v472_v60 = vmul.f32 %v919_v59, %v470_v58  ;;  %vm477_vm13 = vweird.f32 %v919_v59 }
 0x150   : > { %v427_v48 = vmul.f32 %v917_v45, %v426_v47  ;;  %v424_v53 = vsel %vm423_vm9, %v915_v40, %v420_v49  ;;  %vm478_vm14 = vmor %vm476_vm12, %vm477_vm13 }
 0x151   : > { %v435_v55 = vmul.f32 %v424_v53, %v401_v25  ;;  %v473_v62 = vsub.f32 1.0, %v472_v60 }
 0x152   : > { %v428_v50 = vmul.f32 0.5, %v427_v48 }
 0x153   : > { %v474_v1 = vmul.f32 %v919_v59, %v473_v62 }
 0x154   : > { %v429_v51 = vsub.f32 1.5, %v428_v50 }
 0x155   : > { %v475_v4 = vadd.f32 %v919_v59, %v474_v1 }
 0x156   : > { %v430_v52 = vmul.f32 %v917_v45, %v429_v51 }
 0x157   : > { %v479_v6 = vsel %vm478_vm14, %v919_v59, %v475_v4 }
 0x158   : > { %v434_v54 = vsel %vm433_vm11, %v917_v45, %v430_v52  ;;  %v484_v7 = vsel %vm481_vm15, %v483_v2, %v479_v6 }
 0x159   : > { %v436_v56 = vmul.f32 %v434_v54, %v402_v31  ;;  %827 = vpush %v484_v7  ;;  %v813_v31 = vld [vmem:[%s1249_s20 + $0x8] sm:$0xff] }
 0x15b   : > { %v437_v57 = vpack.c.bf16 %v436_v56, %v435_v55  ;;  %v911_v56 = vld [vmem:[%s353_s18] ss:$0 sm:$0xff] }
 0x15d   : > { %770 = vmatmul.msk.bf16.vlgmr.msra.gmra.mxu0 %vm383_vm0, %v437_v57  ;;  %vm494_vm0 = vcmp.lt.s32.totalorder %v1267_v17, %v493_v12  ;;  %v819_v17 = vld [vmem:[%s1249_s20 + $0x38] sm:$0xff] }
 0x15e   : > { %v771_v16 = vsel %vm494_vm0, 1.0, %v1084_v22  ;;  %602 = vmatpush.bf16.msra.mxu1 %v819_v17  ;;  %v818_v22 = vld [vmem:[%s1249_s20 + $0x30] sm:$0xff] }
 0x162   : > { %603 = vmatpush.bf16.msra.mxu1 %v818_v22 }
 0x166   : > { %604 = vmatpush.bf16.msra.mxu1 %v817_v27 }
 0x16a   : > { %605 = vmatpush.bf16.msra.mxu1 %v816_v28 }
 0x16e   : > { %606 = vmatpush.bf16.msra.mxu1 %v815_v29 }
 0x172   : > { %607 = vmatpush.bf16.msra.mxu1 %v814_v30 }
 0x176   : > { %608 = vmatpush.bf16.msra.mxu1 %v813_v31 }
 0x17a   : > { %609 = vmatpush.bf16.msra.mxu1 %v812_v32 }
 0x18a   : > { %s828_s12 = spop %827 }
 0x18b   : > { %v490_v13 = vstv %s828_s12 }
 0x1da   : > { %v462_v3 = vpop.f32.mrf.mxu0 }
 0x1db   : > { %v463_v5 = vadd.f32 %v910_v0, %v462_v3 }
 0x1dd   : > { %920 = vtanh.f32 %v463_v5 }
 0x1e2   : > { %v464_v8 = vpop.f32.mrf.mxu0 }
 0x1e3   : > { %v921_v9 = vpop.eup %920  ;;  %v465_v10 = vadd.f32 %v910_v0, %v464_v8 }
 0x1e4   : > { %486 = vadd.xlane.f32.xlu2 %v921_v9 }
 0x1e5   : > { %922 = vtanh.f32 %v465_v10 }
 0x1eb   : > { %v923_v11 = vpop.eup %922 }
 0x1ec   : > { %488 = vadd.xlane.f32.xlu2 %v923_v11 }
 0x257   : > { %v487_v14 = vpop.xlane.xlu2 %486 }
 0x258   : > { %v491_v15 = vmul.f32 %v490_v13, %v487_v14 }
 0x25a   : > { %v497_v18 = vsub.f32 %v921_v9, %v491_v15 }
 0x25c   : > { %v499_v19 = vmul.f32 %v771_v16, %v497_v18 }
 0x25e   : > { %v501_v20 = vmul.f32 %v499_v19, %v499_v19 }
 0x25f   : > { %v489_v21 = vpop.xlane.xlu2 %488 }
 0x260   : > { %v492_v23 = vmul.f32 %v490_v13, %v489_v21  ;;  %503 = vadd.xlane.f32.xlu0 %v501_v20 }
 0x262   : > { %v498_v24 = vsub.f32 %v923_v11, %v492_v23 }
 0x264   : > { %v500_v25 = vmul.f32 %v771_v16, %v498_v24 }
 0x266   : > { %v502_v26 = vmul.f32 %v500_v25, %v500_v25 }
 0x268   : > { %505 = vadd.xlane.f32.xlu1 %v502_v26 }
 0x2d3   : > { %v504_v33 = vpop.xlane.xlu0 %503 }
 0x2d4   : > { %v507_v34 = vmul.f32 %v504_v33, %v490_v13 }
 0x2d6   : > { %v509_v35 = vadd.f32 1e-05, %v507_v34 }
 0x2d8   : > { %924 = vrsqrt.f32 %v509_v35  ;;  %vm517_vm2 = vweird.f32 %v509_v35 }
 0x2db   : > { %v506_v36 = vpop.xlane.xlu1 %505 }
 0x2dc   : > { %v508_v37 = vmul.f32 %v506_v36, %v490_v13 }
 0x2de   : > { %v925_v38 = vpop.eup %924  ;;  %v510_v39 = vadd.f32 1e-05, %v508_v37 }
 0x2df   : > { %v512_v40 = vmul.f32 %v925_v38, %v509_v35  ;;  %vm518_vm1 = vweird.f32 %v925_v38 }
 0x2e0   : > { %926 = vrsqrt.f32 %v510_v39  ;;  %vm519_vm4 = vmor %vm517_vm2, %vm518_vm1  ;;  %vm527_vm5 = vweird.f32 %v510_v39 }
 0x2e1   : > { %v513_v41 = vmul.f32 %v925_v38, %v512_v40 }
 0x2e3   : > { %v514_v42 = vmul.f32 0.5, %v513_v41 }
 0x2e5   : > { %v515_v44 = vsub.f32 1.5, %v514_v42 }
 0x2e6   : > { %v927_v43 = vpop.eup %926 }
 0x2e7   : > { %v522_v45 = vmul.f32 %v927_v43, %v510_v39  ;;  %v516_v48 = vmul.f32 %v925_v38, %v515_v44  ;;  %vm528_vm3 = vweird.f32 %v927_v43 }
 0x2e8   : > { %vm529_vm6 = vmor %vm527_vm5, %vm528_vm3 }
 0x2e9   : > { %v523_v46 = vmul.f32 %v927_v43, %v522_v45  ;;  %v520_v50 = vsel %vm519_vm4, %v925_v38, %v516_v48 }
 0x2ea   : > { %v531_v53 = vmul.f32 %v520_v50, %v499_v19 }
 0x2eb   : > { %v524_v47 = vmul.f32 0.5, %v523_v46 }
 0x2ed   : > { %v525_v49 = vsub.f32 1.5, %v524_v47 }
 0x2ef   : > { %v526_v51 = vmul.f32 %v927_v43, %v525_v49 }
 0x2f1   : > { %v530_v52 = vsel %vm529_vm6, %v927_v43, %v526_v51 }
 0x2f2   : > { %v532_v54 = vmul.f32 %v530_v52, %v500_v25 }
 0x2f4   : > { %v533_v55 = vpack.c.bf16 %v532_v54, %v531_v53 }
 0x2f6   : > { %610 = vmatmul.bf16.vlgmr.msra.gmra.mxu1 %v533_v55 }
 0x373   : > { %v611_v57 = vpop.f32.mrf.mxu1 }
 0x374   : > { %v612_v58 = vadd.f32 %v911_v56, %v611_v57 }
 0x376   : > { %928 = vtanh.f32 %v612_v58 }
 0x37b   : > { %v613_v59 = vpop.f32.mrf.mxu1 }
 0x37c   : > { %v929_v60 = vpop.eup %928  ;;  %v614_v61 = vadd.f32 %v911_v56, %v613_v59 }
 0x37d   : > { %618 = vst [vmem:[%s330_s8] sm:$0xff] %v929_v60 }
 0x37e   : > { %930 = vtanh.f32 %v614_v61 }
 0x384   : > { %v931_v62 = vpop.eup %930 }
 0x385   : > { %619 = vst [vmem:[%s330_s8 + $0x8] sm:$0xff] %v931_v62 }
 0x386   : > { %1013 = shalt.err (!%p1010_p13)
}
 0x387   : > { %s1085_s20 = smov 128   ;;  %s1086_s26 = smov 8  }
 0x388   : > { %833 = dma.vmem_to_hbm [thread:$0]  (%p1203_p11), %s634_s19, 256, %s636_s21, %s621_s22, %s1085_s20, %s1085_s20, %s1086_s26  }
 0x389 PF: > { %p846_p2 = scmp.ge.s32.totalorder %s1078_s13, 2  ;;  %s650_s29 = sand.u32 1, %s1054_s9  }
 0x38a   : > { %s651_s25 = scalar_lea.sflag [#allocation7], %s650_s29 }
 0x38b   : > { %p842_p3 = pnand %p846_p2, %p1208_p0 }
 0x38d   : > { %p843_p5 = pneg %p842_p3 }
 0x38f   : > { %1049 = dma.done.wait (%p843_p5), %s651_s25, 256  }
 0x390   : > { %1051 = vsyncadd (%p843_p5), %s651_s25, 4294967040  ;;  %s1382_s13 = sld [smem:[#allocation16_spill]]  ;;  %s1387_s9 = smov %s1058_s0 }
 0x391   : > { %s1383_s23 = sld [smem:[#allocation14_spill]]  ;;  %s1389_s1 = smov %s1070_s11 }
 0x392   : > { %s1384_s10 = sld [smem:[#allocation17_spill]] }
 0x393   : > { %s1385_s24 = sld [smem:[#allocation15_spill]] }
 0x394   : > { %s1386_s12 = sld [smem:[#allocation18_spill]] }
 0x396   : > { %p33_p11 = scmp.ge.s32.totalorder %s1382_s13, 5  }
 0x397   : > { %s1388_s0 = smov %s1383_s23 }
 0x398   :  { %35 = sbr.rel (!%p33_p11) target bundleno = 14 (0xe), region = 97 }
 0x399   : > { %s1390_s11 = smov %s1385_s24 }
 0x39d   :  { %657 = vsyncpa [#allocation6], 1 }
 0x39e   :  { %659 = vsyncpa [#allocation6 + $0x1], 1 }
 0x39f   :  { %660 = vsyncpa [#allocation7], 1 }
 0x3a0   :  { %662 = vsyncpa [#allocation7 + $0x1], 1 }

</bundles_post_ra>
